<compile_context>
chip_gen: v7x
topology: tpu7x:2x2x1
jax: 0.10.0
libtpu: 0.0.40
codegen_flags: <defaults>
</compile_context>

<pallas_src>
import functools

import jax
import jax.numpy as jnp
from jax.experimental import pallas as pl
from jax.experimental.pallas import tpu as pltpu


def _round_up(n: int, m: int) -> int:
    return ((n + m - 1) // m) * m


def _pick_row_tile(rows: int, d_padded: int) -> int:
    """VMEM-aware row tile: ~3 MiB of f32 per tile, multiple of 16 rows."""
    TARGET_TILE_BYTES = 3 * 1024 * 1024  # ~3 MiB -> ~5-6x that of VMEM in flight
    tr = TARGET_TILE_BYTES // max(1, d_padded * 4)
    tr = max(16, min(tr, rows))
    if rows > 16:
        # Prefer >= 2 grid steps so both v7x TensorCores get row tiles.
        tr = min(tr, max(16, _round_up(pl.cdiv(rows, 2), 16)))
    tr = _round_up(tr, 16)           # 16-row multiple (covers bf16 sublane packing)
    return min(tr, _round_up(rows, 16))


def _layernorm_kernel(x_ref, w_ref, b_ref, o_ref, *, eps, inv_d, d_real, d_padded):
    # Upcast to f32 for all internal math (mandatory on v5e, better numerics
    # everywhere); I/O stays in the caller's dtype.
    x = x_ref[...].astype(jnp.float32)                        # (TR, Dp)

    # Row mean over the *real* feature count (padded lanes are zero).
    mean = jnp.sum(x, axis=-1, keepdims=True) * inv_d         # (TR, 1)
    xc = x - mean

    if d_padded != d_real:
        # Zero the padded lanes so they do not contribute to the variance.
        lane = jax.lax.broadcasted_iota(jnp.int32, xc.shape, dimension=xc.ndim - 1)
        xc = jnp.where(lane < d_real, xc, 0.0)

    # Population variance (unbiased=False).
    var = jnp.sum(xc * xc, axis=-1, keepdims=True) * inv_d    # (TR, 1)

    # NB: torch module adds eps to sqrt(var), not inside the sqrt.
    denom = jnp.sqrt(var) + eps
    inv = pl.reciprocal(denom, approx=True)                   # EUP, free slot
    inv = inv * (2.0 - denom * inv)                           # one Newton step -> ~f32

    y = (xc * inv) * w_ref[...] + b_ref[...]
    o_ref[...] = y.astype(o_ref.dtype)


def layernorm_pallas(x, w, b, eps):
    orig_shape = x.shape
    D = orig_shape[-1]
    rows = 1
    for s in orig_shape[:-1]:
        rows *= s
    x2 = x.reshape(rows, D)

    # Lane-dense feature axis: pad D to a multiple of 128 (dense vst's).
    Dp = _round_up(D, 128)
    if Dp != D:
        x2 = jnp.pad(x2, ((0, 0), (0, Dp - D)))
        w_p = jnp.pad(w.astype(jnp.float32), (0, Dp - D)).reshape(1, Dp)
        b_p = jnp.pad(b.astype(jnp.float32), (0, Dp - D)).reshape(1, Dp)
    else:
        w_p = w.astype(jnp.float32).reshape(1, Dp)
        b_p = b.astype(jnp.float32).reshape(1, Dp)

    tr = _pick_row_tile(rows, Dp)
    grid = (pl.cdiv(rows, tr),)     # partial last row-block is fine (masked store)

    kernel = functools.partial(
        _layernorm_kernel,
        eps=float(eps),
        inv_d=1.0 / float(D),
        d_real=D,
        d_padded=Dp,
    )

    out = pl.pallas_call(
        kernel,
        out_shape=jax.ShapeDtypeStruct((rows, Dp), x.dtype),
        grid_spec=pltpu.PrefetchScalarGridSpec(
            num_scalar_prefetch=0,
            grid=grid,
            in_specs=[
                pl.BlockSpec((tr, Dp), lambda i: (i, 0)),   # x row tile
                pl.BlockSpec((1, Dp), lambda i: (0, 0)),    # w (broadcast, f32)
                pl.BlockSpec((1, Dp), lambda i: (0, 0)),    # b (broadcast, f32)
            ],
            out_specs=pl.BlockSpec((tr, Dp), lambda i: (i, 0)),
        ),
        compiler_params=pltpu.CompilerParams(
            dimension_semantics=("parallel",),
            vmem_limit_bytes=48 * 1024 * 1024,   # >16 MiB v5e default, <64 MiB v7x VMEM
        ),
    )(x2, w_p, b_p)

    if Dp != D:
        out = out[:, :D]
    return out.reshape(orig_shape)


def layernorm_ref(x, w, b, eps):
    """Pure-JAX reference mirroring the torch module exactly."""
    xf = x.astype(jnp.float32)
    mean = jnp.mean(xf, axis=-1, keepdims=True)
    var = jnp.mean((xf - mean) ** 2, axis=-1, keepdims=True)  # unbiased=False
    return ((xf - mean) / (jnp.sqrt(var) + eps) * w + b).astype(x.dtype)


if __name__ == "__main__":
    # Small shapes consistent with the module's [batch, posn, d_model] input.
    batch, seq, d_model = 2, 8, 32
    eps = 1e-5

    key = jax.random.PRNGKey(0)
    kx, kw, kb = jax.random.split(key, 3)

    x = jax.random.normal(kx, (batch, seq, d_model), dtype=jnp.float32)
    # Non-trivial affine params to exercise the scale/shift path.
    w = 1.0 + 0.02 * jax.random.normal(kw, (d_model,), dtype=jnp.float32)
    b = 0.02 * jax.random.normal(kb, (d_model,), dtype=jnp.float32)

    out = layernorm_pallas(x, w, b, eps)
    out = jax.block_until_ready(out)

    ref = layernorm_ref(x, w, b, eps)
    assert out.shape == (batch, seq, d_model)
    assert jnp.allclose(out, ref, rtol=1e-5, atol=1e-5), "mismatch vs reference"

    print("KERNEL_OK")
</pallas_src>

<mosaic_0001>
module attributes {stable_mosaic.version = 11 : i64} {
  func.func @_layernorm_kernel(%arg0: i32, %arg1: memref<16x128xf32, #tpu.memory_space<vmem>>, %arg2: memref<1x128xf32, #tpu.memory_space<vmem>>, %arg3: memref<1x128xf32, #tpu.memory_space<vmem>>, %arg4: memref<16x128xf32, #tpu.memory_space<vmem>>) attributes {dimension_semantics = [#tpu.dimension_semantics<parallel>], iteration_bounds = array<i64: 1>, scalar_prefetch = 0 : i64, scratch_operands = 0 : i64, tpu.core_type = #tpu.core_type<tc>, window_params = [{transform_indices = @transform_0, window_bounds = array<i64: 16, 128>}, {pipeline_mode = #tpu.pipeline_mode<synchronous>, transform_indices = @transform_1, window_bounds = array<i64: 1, 128>}, {pipeline_mode = #tpu.pipeline_mode<synchronous>, transform_indices = @transform_2, window_bounds = array<i64: 1, 128>}, {transform_indices = @transform_3, window_bounds = array<i64: 16, 128>}]} {
    %c0 = arith.constant 0 : index
    %c0_0 = arith.constant 0 : index
    %0 = vector.load %arg1[%c0, %c0_0] : memref<16x128xf32, #tpu.memory_space<vmem>>, vector<16x128xf32>
    %cst = arith.constant dense<0.000000e+00> : vector<16xf32>
    %1 = vector.multi_reduction <add>, %0, %cst [1] : vector<16x128xf32> to vector<16xf32>
    %2 = vector.shape_cast %1 : vector<16xf32> to vector<16x1xf32>
    %cst_1 = arith.constant 3.125000e-02 : f32
    %3 = vector.broadcast %cst_1 : f32 to vector<16x1xf32>
    %4 = arith.mulf %2, %3 : vector<16x1xf32>
    %5 = vector.broadcast %4 : vector<16x1xf32> to vector<16x128xf32>
    %6 = arith.subf %0, %5 : vector<16x128xf32>
    %7 = tpu.iota {dimensions = array<i32: 1>} : vector<16x128xi32>
    %c32_i32 = arith.constant 32 : i32
    %8 = vector.broadcast %c32_i32 : i32 to vector<16x128xi32>
    %9 = arith.cmpi slt, %7, %8 : vector<16x128xi32>
    %cst_2 = arith.constant 0.000000e+00 : f32
    %10 = vector.broadcast %cst_2 : f32 to vector<16x128xf32>
    %11 = arith.select %9, %6, %10 : vector<16x128xi1>, vector<16x128xf32>
    %12 = arith.mulf %11, %11 : vector<16x128xf32>
    %cst_3 = arith.constant dense<0.000000e+00> : vector<16xf32>
    %13 = vector.multi_reduction <add>, %12, %cst_3 [1] : vector<16x128xf32> to vector<16xf32>
    %14 = vector.shape_cast %13 : vector<16xf32> to vector<16x1xf32>
    %cst_4 = arith.constant 3.125000e-02 : f32
    %15 = vector.broadcast %cst_4 : f32 to vector<16x1xf32>
    %16 = arith.mulf %14, %15 : vector<16x1xf32>
    %17 = math.sqrt %16 : vector<16x1xf32>
    %cst_5 = arith.constant 9.99999974E-6 : f32
    %18 = vector.broadcast %cst_5 : f32 to vector<16x1xf32>
    %19 = arith.addf %17, %18 : vector<16x1xf32>
    %20 = tpu.reciprocal %19 {approx = true} : vector<16x1xf32> -> vector<16x1xf32>
    %21 = arith.mulf %19, %20 : vector<16x1xf32>
    %cst_6 = arith.constant 2.000000e+00 : f32
    %22 = vector.broadcast %cst_6 : f32 to vector<16x1xf32>
    %23 = arith.subf %22, %21 : vector<16x1xf32>
    %24 = arith.mulf %20, %23 : vector<16x1xf32>
    %25 = vector.broadcast %24 : vector<16x1xf32> to vector<16x128xf32>
    %26 = arith.mulf %11, %25 : vector<16x128xf32>
    %c0_7 = arith.constant 0 : index
    %c0_8 = arith.constant 0 : index
    %27 = vector.load %arg2[%c0_7, %c0_8] : memref<1x128xf32, #tpu.memory_space<vmem>>, vector<1x128xf32>
    %28 = vector.broadcast %27 : vector<1x128xf32> to vector<16x128xf32>
    %29 = arith.mulf %26, %28 : vector<16x128xf32>
    %c0_9 = arith.constant 0 : index
    %c0_10 = arith.constant 0 : index
    %30 = vector.load %arg3[%c0_9, %c0_10] : memref<1x128xf32, #tpu.memory_space<vmem>>, vector<1x128xf32>
    %31 = vector.broadcast %30 : vector<1x128xf32> to vector<16x128xf32>
    %32 = arith.addf %29, %31 : vector<16x128xf32>
    %c0_11 = arith.constant 0 : index
    %c0_12 = arith.constant 0 : index
    %33 = vector.load %arg4[%c0_11, %c0_12] : memref<16x128xf32, #tpu.memory_space<vmem>>, vector<16x128xf32>
    tpu.vector_store %arg4[%c0_11, %c0_12], %32 {strides = array<i32>} : memref<16x128xf32, #tpu.memory_space<vmem>>, vector<16x128xf32>,
    return
  }
  func.func @transform_0(%arg0: i32) -> (i32, i32) {
    %c0_i32 = arith.constant 0 : i32
    %c0_i32_0 = arith.constant 0 : i32
    return %arg0, %c0_i32 : i32, i32
  }
  func.func @transform_1(%arg0: i32) -> (i32, i32) {
    %c0_i32 = arith.constant 0 : i32
    %c0_i32_0 = arith.constant 0 : i32
    %c0_i32_1 = arith.constant 0 : i32
    return %c0_i32, %c0_i32_0 : i32, i32
  }
  func.func @transform_2(%arg0: i32) -> (i32, i32) {
    %c0_i32 = arith.constant 0 : i32
    %c0_i32_0 = arith.constant 0 : i32
    %c0_i32_1 = arith.constant 0 : i32
    return %c0_i32, %c0_i32_0 : i32, i32
  }
  func.func @transform_3(%arg0: i32) -> (i32, i32) {
    %c0_i32 = arith.constant 0 : i32
    %c0_i32_0 = arith.constant 0 : i32
    return %arg0, %c0_i32 : i32, i32
  }
}

</mosaic_0001>

<bundles_post_ra>
// kernel: tpu_custom_call.1
= control target key start
LH: loop header
LB: loop body
LE: loop exit
PB: predicated region body
PF: predicated region fallthrough
CT: control target
= control target key end

     0   :  { %8 = vsyncpa [#allocation3], 0  ;;  %s237_s0 = inlined_call_operand.hbm [shape: f32[16,128], index: 0, kind: input, shape index: {}]   ;;  %s238_s1 = inlined_call_operand.vmem [shape: f32[1,128], index: 1, kind: input, shape index: {}]   ;;  %s239_s2 = inlined_call_operand.vmem [shape: f32[1,128], index: 2, kind: input, shape index: {}]   ;;  %s240_s3 = inlined_call_operand.hbm [shape: f32[16,128], index: 3, kind: output, shape index: {}]  }
   0x1   :  { %9 = vsyncpa [#allocation4], 0  ;;  %s177_s12 = smov [#allocation2]   ;;  %s129_s16 = scalar_lea.hbm %s237_s0, 256 }
   0x2   :  { %s15_s13 = sshll.u32 %s177_s12, 4  ;;  %p130_p0 = scmp.ne.s32.totalorder %s237_s0, %s129_s16  ;;  %s16_s13 = int_to_ptr.vmem [resolvable:$true] %s15_s13 }
   0x3   :  { %p133_p1 = scmp.lt.u32.totalorder %s129_s16, %s237_s0 }
   0x5   :  { %p135_p2 = pnand %p133_p1, %p130_p0 }
   0x7   :  { %138 = shalt.err (!%p135_p2)
}
   0x8   :  { %s139_s21 = scalar_lea.vmem %s16_s13, 256  ;;  %p144_p4 = scmp.lt.s32.totalorder %s16_s13, %s16_s13 }
   0x9   :  { %p140_p3 = scmp.ne.s32.totalorder %s16_s13, %s139_s21  ;;  %p145_p5 = scmp.lt.s32.totalorder %s139_s21, %s139_s21 }
   0xb   :  { %p146_p6 = por %p145_p5, %p144_p4 }
   0xd   :  { %p147_p7 = pnand %p146_p6, %p140_p3 }
   0xf   :  { %150 = shalt.err (!%p147_p7)
}
  0x10   :  { %s178_s22 = smov 128   ;;  %s179_s23 = smov 8  }
  0x11   :  { %21 = dma.hbm_to_vmem [thread:$0]  %s237_s0, 256, %s16_s13, [#allocation3], %s178_s22, %s178_s22, %s179_s23  }
  0x12   :  { %173 = dma.done.wait [#allocation3], 256  }
  0x13   :  { %174 = vsyncadd [#allocation3], 4294967040  ;;  %v29_v0 = vld [vmem:[#allocation2] sm:$0xff]  ;;  %v30_v1 = vld [vmem:[#allocation2 + $0x8] sm:$0xff]  ;;  %v39_v2 = vlaneseq  ;;  %s180_s29 = smov [#allocation5]  }
  0x14   :  { %31 = vadd.xlane.f32.xlu0 %v29_v0  ;;  %v115_v36 = vld [vmem:[%s238_s1] ss:$0 sm:$0xff]  ;;  %s103_s30 = sshll.u32 %s180_s29, 4  ;;  %s104_s30 = int_to_ptr.vmem [resolvable:$true] %s103_s30 }
  0x15   :  { %v40_v3 = vand.u32 127, %v39_v2  ;;  %v116_v39 = vld [vmem:[%s239_s2] ss:$0 sm:$0xff]  ;;  %s151_s4 = scalar_lea.vmem %s104_s30, 256  ;;  %p156_p9 = scmp.lt.s32.totalorder %s104_s30, %s104_s30 }
  0x16   :  { %p152_p8 = scmp.ne.s32.totalorder %s104_s30, %s151_s4  ;;  %p157_p10 = scmp.lt.s32.totalorder %s151_s4, %s151_s4 }
  0x17   :  { %vm41_vm0 = vcmp.lt.s32.totalorder %v40_v3, 32 }
  0x18   :  { %33 = vadd.xlane.f32.xlu0 %v30_v1  ;;  %p158_p11 = por %p157_p10, %p156_p9 }
  0x1a   :  { %p159_p12 = pnand %p158_p11, %p152_p8 }
  0xa1   :  { %v32_v4 = vpop.xlane.xlu0 %31 }
  0xa2   :  { %v35_v5 = vmul.f32 0.03125, %v32_v4 }
  0xa4   :  { %v37_v6 = vsub.f32 %v29_v0, %v35_v5 }
  0xa5   :  { %v34_v7 = vpop.xlane.xlu0 %33 }
  0xa6   :  { %v36_v8 = vmul.f32 0.03125, %v34_v7  ;;  %v42_v9 = vsel %vm41_vm0, %v37_v6, 0.0 }
  0xa7   :  { %v44_v10 = vmul.f32 %v42_v9, %v42_v9 }
  0xa8   :  { %v38_v11 = vsub.f32 %v30_v1, %v36_v8 }
  0xa9   :  { %46 = vadd.xlane.f32.xlu1 %v44_v10 }
  0xaa   :  { %v43_v12 = vsel %vm41_vm0, %v38_v11, 0.0 }
  0xab   :  { %v45_v13 = vmul.f32 %v43_v12, %v43_v12 }
  0xad   :  { %48 = vadd.xlane.f32.xlu1 %v45_v13 }
 0x136   :  { %v47_v14 = vpop.xlane.xlu1 %46 }
 0x137   :  { %v50_v15 = vmul.f32 0.03125, %v47_v14 }
 0x139   :  { %121 = vrsqrt.f32 %v50_v15  ;;  %vm54_vm1 = vcmp.eq.f32.partialorder %v50_v15, inf  ;;  %v57_v20 = vand.u32 2147483648, %v50_v15  ;;  %vm56_vm2 = vcmp.eq.f32.partialorder %v50_v15, 0.0 }
 0x13a   :  { %v49_v16 = vpop.xlane.xlu1 %48 }
 0x13b   :  { %v51_v17 = vmul.f32 0.03125, %v49_v16 }
 0x13d   :  { %123 = vrsqrt.f32 %v51_v17  ;;  %vm61_vm3 = vcmp.eq.f32.partialorder %v51_v17, inf  ;;  %v64_v26 = vand.u32 2147483648, %v51_v17  ;;  %vm63_vm4 = vcmp.eq.f32.partialorder %v51_v17, 0.0 }
 0x143   :  { %v122_v18 = vpop.eup %121 }
 0x144   :  { %v53_v19 = vmul.f32 %v122_v18, %v50_v15 }
 0x146   :  { %v55_v21 = vsel %vm54_vm1, %v50_v15, %v53_v19 }
 0x147   :  { %v124_v22 = vpop.eup %123  ;;  %v58_v23 = vsel %vm56_vm2, %v57_v20, %v55_v21 }
 0x148   :  { %v60_v24 = vmul.f32 %v124_v22, %v51_v17  ;;  %v66_v25 = vadd.f32 1e-05, %v58_v23 }
 0x14a   :  { %v62_v27 = vsel %vm61_vm3, %v51_v17, %v60_v24  ;;  %125 = vrcp.f32 %v66_v25 }
 0x14b   :  { %v65_v28 = vsel %vm63_vm4, %v64_v26, %v62_v27 }
 0x14c   :  { %v67_v29 = vadd.f32 1e-05, %v65_v28 }
 0x14e   :  { %127 = vrcp.f32 %v67_v29 }
 0x154   :  { %v126_v30 = vpop.eup %125 }
 0x155   :  { %v70_v31 = vmul.f32 %v126_v30, %v66_v25 }
 0x157   :  { %v72_v32 = vsub.f32 2.0, %v70_v31 }
 0x158   :  { %v128_v33 = vpop.eup %127 }
 0x159   :  { %v71_v34 = vmul.f32 %v128_v33, %v67_v29  ;;  %v74_v35 = vmul.f32 %v126_v30, %v72_v32 }
 0x15b   :  { %v73_v37 = vsub.f32 2.0, %v71_v34  ;;  %v76_v38 = vmul.f32 %v74_v35, %v42_v9 }
 0x15d   :  { %v75_v40 = vmul.f32 %v128_v33, %v73_v37  ;;  %v85_v41 = vmul.f32 %v115_v36, %v76_v38 }
 0x15f   :  { %v77_v42 = vmul.f32 %v75_v40, %v43_v12  ;;  %v94_v43 = vadd.f32 %v116_v39, %v85_v41 }
 0x161   :  { %v86_v44 = vmul.f32 %v115_v36, %v77_v42  ;;  %96 = vst [vmem:[#allocation5] sm:$0xff] %v94_v43 }
 0x163   :  { %v95_v45 = vadd.f32 %v116_v39, %v86_v44 }
 0x165   :  { %97 = vst [vmem:[#allocation5 + $0x8] sm:$0xff] %v95_v45 }
 0x166   :  { %162 = shalt.err (!%p159_p12)
}
 0x167   :  { %s163_s5 = scalar_lea.hbm %s240_s3, 256 }
 0x168   :  { %p164_p13 = scmp.ne.s32.totalorder %s240_s3, %s163_s5  ;;  %p167_p0 = scmp.lt.u32.totalorder %s163_s5, %s240_s3 }
 0x16a   :  { %p169_p1 = pnand %p167_p0, %p164_p13 }
 0x16c   :  { %172 = shalt.err (!%p169_p1)
}
 0x16d   :  { %109 = dma.vmem_to_hbm [thread:$0]  %s104_s30, 256, %s240_s3, [#allocation4], %s178_s22, %s178_s22, %s179_s23  }
 0x16e   :  { %175 = dma.done.wait [#allocation4], 256  }
 0x16f   :  { %176 = vsyncadd [#allocation4], 4294967040 }
 0x170   :  { %113 = vsyncpa [#allocation3], 1 }
 0x171   :  { %114 = vsyncpa [#allocation4], 1 }

</bundles_post_ra>
